<compile_context>
chip_gen: v5e
topology: v5e:2x2
jax: 0.10.0
libtpu: 0.0.40
codegen_flags: <defaults>
</compile_context>

<pallas_src>
import functools
import math

import jax
import jax.numpy as jnp
from jax.experimental import pallas as pl
from jax.experimental.pallas import tpu as pltpu

_EPS = 1e-6
_LANES = 128
_MAX_PACKED_WIDTH = 512               # cap on lcm(feat, 128) for the packed path
_BLOCK_BYTES_CAP = 4 * 1024 * 1024    # target bytes per *input* block
_MIN_BLOCK_BYTES = 1 * 1024 * 1024    # don't shrink blocks below this for steps
_MIN_GRID_STEPS = 8                   # >= 4 steps per TensorCore on v7x megacore


# ----------------------------------------------------------------------------
# Generation-aware VMEM sizing.
# ----------------------------------------------------------------------------
@functools.lru_cache(maxsize=None)
def _vmem_limit_bytes():
    """Scoped-VMEM limit: generous on v5e/v6e (128 MiB physical), tighter on
    v7x (64 MiB per TensorCore), conservative when the query is unavailable."""
    try:
        cap = int(pltpu.get_tpu_info().vmem_capacity_bytes)
    except Exception:  # off-TPU / older runtimes: fall back to a safe value
        cap = 0
    if cap >= 96 * 1024 * 1024:        # v5e / v6e
        return 64 * 1024 * 1024
    if cap > 0:                        # v7x (64 MiB per TC)
        return 36 * 1024 * 1024
    return 32 * 1024 * 1024            # unknown


def _vmem_tile_budget():
    # Leave headroom under the scoped limit for compiler scratch / pipelining.
    return (_vmem_limit_bytes() * 3) // 4


# ----------------------------------------------------------------------------
# Kernels.
# ----------------------------------------------------------------------------
def _standardize_rows_kernel(x_ref, o_ref):
    """Generic path: one logical row per sublane row, reduce over lanes."""
    x = x_ref[...].astype(jnp.float32)                       # (TR, F)
    n = x.shape[-1]
    mean = jnp.mean(x, axis=-1, keepdims=True)
    diff = x - mean
    # torch.std is unbiased (divides by N-1).  N == 1 -> 0/0 = NaN, same as
    # torch.std on a single element.
    var = jnp.sum(diff * diff, axis=-1, keepdims=True) / jnp.float32(n - 1)
    inv = pl.reciprocal(jnp.sqrt(var) + _EPS, approx=False)  # (TR, 1) per row
    o_ref[...] = (diff * inv).astype(o_ref.dtype)


def _standardize_packed_kernel(seg_ref, x_ref, o_ref, *, feat):
    """Lane-dense path: k = W // feat original rows packed per W-lane row.

    seg[i, j] = 1 iff lanes i and j belong to the same feat-wide segment
    (same original row), so `x @ seg` is a per-segment all-reduce on the
    otherwise-idle MXU.  Each output row depends only on the same input row,
    which keeps ragged last blocks safe (junk padded rows stay junk).

    The f32 segment sums use an explicit 2-pass bf16 hi/lo split against the
    exactly-bf16-representable 0/1 seg matrix: same accuracy class as
    Precision.HIGH at fewer MXU passes than HIGHEST.
    """
    seg = seg_ref[...]                                       # (W, W) bf16 0/1
    x = x_ref[...].astype(jnp.float32)                       # (TR, W)

    def seg_sum(a):
        hi = a.astype(jnp.bfloat16)
        lo = (a - hi.astype(jnp.float32)).astype(jnp.bfloat16)
        return (jnp.dot(hi, seg, preferred_element_type=jnp.float32)
                + jnp.dot(lo, seg, preferred_element_type=jnp.float32))

    mean = seg_sum(x) * jnp.float32(1.0 / feat)              # (TR, W)
    diff = x - mean
    var = seg_sum(diff * diff) * jnp.float32(1.0 / (feat - 1))   # unbiased
    inv = pl.reciprocal(jnp.sqrt(var) + _EPS, approx=False)  # EUP slot
    o_ref[...] = (diff * inv).astype(o_ref.dtype)


# ----------------------------------------------------------------------------
# Tiling / packing policy.
# ----------------------------------------------------------------------------
def _round_up(n, m):
    return -(-n // m) * m


def _sublane_multiple(itemsize):
    """Native sublane packing: 8 rows f32, 16 bf16/f16, 32 int8/fp8."""
    return 8 * max(1, 4 // itemsize)


def _pick_row_tile(rows, width, itemsize, extra_vmem_bytes=0):
    """Largest row tile that (a) fits the VMEM budget, (b) keeps the input
    block <= ~4 MiB, and (c) leaves >= _MIN_GRID_STEPS grid steps whenever
    each step still moves >= ~1 MiB; rounded to the dtype's sublane packing."""
    sub = _sublane_multiple(itemsize)
    if rows <= sub:
        return rows                      # single full-extent block

    rows_rounded = _round_up(rows, sub)
    row_bytes = width * itemsize

    # in + out double-buffered plus ~4 f32-wide intermediates per element.
    per_row_vmem = width * (4 * itemsize + 4 * 4)
    budget = _vmem_tile_budget() - extra_vmem_bytes
    budget_rows = max(sub, budget // per_row_vmem)

    cap_rows = max(sub, _BLOCK_BYTES_CAP // row_bytes)       # byte-based cap
    min_rows = max(sub, _MIN_BLOCK_BYTES // row_bytes)       # keep blocks >= 1 MiB

    steps_rows = _round_up(-(-rows // _MIN_GRID_STEPS), sub)
    steps_rows = max(steps_rows, min(min_rows, rows_rounded))

    tile = min(budget_rows, cap_rows, steps_rows, rows_rounded)
    return max(sub, (tile // sub) * sub)


def _packing(rows, feat, sub):
    """Return (k, W) for the lane-dense packed path, or None for generic."""
    if not (1 < feat < _LANES):
        return None
    k = _LANES // math.gcd(feat, _LANES)      # original rows per packed row
    width = k * feat                          # = lcm(feat, 128)
    if k < 2 or width > _MAX_PACKED_WIDTH:
        return None
    # Need whole packed rows and at least one sublane-tile of them; otherwise a
    # wrapper-side pad would cost an extra full HBM pass — use the generic path.
    if rows % k != 0 or rows // k < sub:
        return None
    return k, width


def _seg_matrix(width, feat):
    """Block-diagonal 0/1 segment matrix (exactly representable in bf16)."""
    lane = jnp.arange(width, dtype=jnp.int32) // feat
    return (lane[:, None] == lane[None, :]).astype(jnp.bfloat16)


# ----------------------------------------------------------------------------
# pallas_call wrapper.
# ----------------------------------------------------------------------------
def _call(kernel, operands, in_specs, rows, width, row_tile, out_dtype):
    return pl.pallas_call(
        kernel,
        out_shape=jax.ShapeDtypeStruct((rows, width), out_dtype),
        grid_spec=pltpu.PrefetchScalarGridSpec(
            num_scalar_prefetch=0,
            grid=(pl.cdiv(rows, row_tile),),   # ragged last block is fine:
            in_specs=in_specs,                 # rows are independent, OOB
            out_specs=pl.BlockSpec((row_tile, width), lambda i: (i, 0)),
        ),
        compiler_params=pltpu.CompilerParams(
            dimension_semantics=("parallel",),
            vmem_limit_bytes=_vmem_limit_bytes(),
        ),
    )(*operands)


def standardize(x):
    """Standardize over the last axis, matching the PyTorch Standardize module."""
    orig_shape = x.shape
    feat = orig_shape[-1]
    rows = math.prod(orig_shape[:-1])
    itemsize = jnp.dtype(x.dtype).itemsize
    sub = _sublane_multiple(itemsize)

    pack = _packing(rows, feat, sub)
    if pack is not None:
        k, width = pack
        rows_p = rows // k
        x2 = x.reshape(rows_p, width)            # contiguous fold — layout only
        seg = _seg_matrix(width, feat)           # built once, outside the kernel
        seg_vmem = 2 * width * width * seg.dtype.itemsize   # resident (x2 buffers)
        row_tile = _pick_row_tile(rows_p, width, itemsize, seg_vmem)
        kernel = functools.partial(_standardize_packed_kernel, feat=feat)
        in_specs = [pl.BlockSpec((width, width), lambda i: (0, 0)),  # DMA'd once
                    pl.BlockSpec((row_tile, width), lambda i: (i, 0))]
        out = _call(kernel, (seg, x2), in_specs, rows_p, width, row_tile, x.dtype)
    else:
        # Generic full-width path.  (Extremely wide feat that overflows the
        # VMEM budget would need an F-tiled two-pass kernel; not needed here.)
        x2 = x.reshape(rows, feat)
        row_tile = _pick_row_tile(rows, feat, itemsize)
        in_specs = [pl.BlockSpec((row_tile, feat), lambda i: (i, 0))]
        out = _call(_standardize_rows_kernel, (x2,), in_specs, rows, feat,
                    row_tile, x.dtype)

    return out.reshape(orig_shape)


# ----------------------------------------------------------------------------
# Reference and self-test.
# ----------------------------------------------------------------------------
def _reference(x):
    x32 = x.astype(jnp.float32)
    mean = jnp.mean(x32, axis=-1, keepdims=True)
    var = jnp.var(x32, axis=-1, keepdims=True, ddof=1)   # unbiased like torch.std
    std = jnp.sqrt(var)
    return ((x32 - mean) / (std + _EPS)).astype(x.dtype)


if __name__ == "__main__":
    # Module is Standardize(feature_dim); forward standardizes the last axis.
    master = jax.random.PRNGKey(0)
    keys = jax.random.split(master, 5)

    # (shape, tol): the packed path routes segment reductions through the MXU
    # with a 2-pass bf16 split (error ~1e-5 level, far below a raw-bf16
    # fallback's ~1e-2); the generic path is pure f32.
    cases = [
        ((2, 8, 32), 1e-5),     # small: generic row path (too few rows to pack)
        ((4, 64, 32), 1e-4),    # lane-dense packed path, feat=32 (k=4, W=128)
        ((4, 64, 48), 1e-4),    # generalized packed path, feat=48 (k=8, W=384)
        ((5, 40, 32), 1e-4),    # packed path with a ragged row block
        ((3, 5, 48), 1e-5),     # generic path (rows % k != 0), ragged block
    ]
    for key_i, (shape, tol) in zip(keys, cases):
        x = jax.random.normal(key_i, shape, dtype=jnp.float32)
        out = jax.block_until_ready(standardize(x))
        ref = _reference(x)
        assert out.shape == x.shape and out.dtype == x.dtype
        assert jnp.allclose(out, ref, atol=tol, rtol=tol), f"mismatch for {shape}"

    print("KERNEL_OK")
</pallas_src>

<mosaic_0001>
module attributes {stable_mosaic.version = 11 : i64} {
  func.func @_standardize_rows_kernel(%arg0: i32, %arg1: memref<16x32xf32, #tpu.memory_space<vmem>>, %arg2: memref<16x32xf32, #tpu.memory_space<vmem>>) attributes {dimension_semantics = [#tpu.dimension_semantics<parallel>], iteration_bounds = array<i64: 1>, scalar_prefetch = 0 : i64, scratch_operands = 0 : i64, tpu.core_type = #tpu.core_type<tc>, window_params = [{transform_indices = @transform_0, window_bounds = array<i64: 16, 32>}, {transform_indices = @transform_1, window_bounds = array<i64: 16, 32>}]} {
    %c0 = arith.constant 0 : index
    %c0_0 = arith.constant 0 : index
    %0 = vector.load %arg1[%c0, %c0_0] : memref<16x32xf32, #tpu.memory_space<vmem>>, vector<16x32xf32>
    %cst = arith.constant dense<0.000000e+00> : vector<16xf32>
    %1 = vector.multi_reduction <add>, %0, %cst [1] : vector<16x32xf32> to vector<16xf32>
    %2 = vector.shape_cast %1 : vector<16xf32> to vector<16x1xf32>
    %cst_1 = arith.constant 3.200000e+01 : f32
    %3 = vector.broadcast %cst_1 : f32 to vector<16x1xf32>
    %4 = arith.divf %2, %3 : vector<16x1xf32>
    %5 = vector.broadcast %4 : vector<16x1xf32> to vector<16x32xf32>
    %6 = arith.subf %0, %5 : vector<16x32xf32>
    %7 = arith.mulf %6, %6 : vector<16x32xf32>
    %cst_2 = arith.constant dense<0.000000e+00> : vector<16xf32>
    %8 = vector.multi_reduction <add>, %7, %cst_2 [1] : vector<16x32xf32> to vector<16xf32>
    %9 = vector.shape_cast %8 : vector<16xf32> to vector<16x1xf32>
    %cst_3 = arith.constant 3.100000e+01 : f32
    %10 = vector.broadcast %cst_3 : f32 to vector<16x1xf32>
    %11 = arith.divf %9, %10 : vector<16x1xf32>
    %12 = math.sqrt %11 : vector<16x1xf32>
    %cst_4 = arith.constant 9.99999997E-7 : f32
    %13 = vector.broadcast %cst_4 : f32 to vector<16x1xf32>
    %14 = arith.addf %12, %13 : vector<16x1xf32>
    %15 = tpu.reciprocal %14 : vector<16x1xf32> -> vector<16x1xf32>
    %16 = vector.broadcast %15 : vector<16x1xf32> to vector<16x32xf32>
    %17 = arith.mulf %6, %16 : vector<16x32xf32>
    %c0_5 = arith.constant 0 : index
    %c0_6 = arith.constant 0 : index
    %18 = vector.load %arg2[%c0_5, %c0_6] : memref<16x32xf32, #tpu.memory_space<vmem>>, vector<16x32xf32>
    tpu.vector_store %arg2[%c0_5, %c0_6], %17 {strides = array<i32>} : memref<16x32xf32, #tpu.memory_space<vmem>>, vector<16x32xf32>,
    return
  }
  func.func @transform_0(%arg0: i32) -> (i32, i32) {
    %c0_i32 = arith.constant 0 : i32
    %c0_i32_0 = arith.constant 0 : i32
    return %arg0, %c0_i32 : i32, i32
  }
  func.func @transform_1(%arg0: i32) -> (i32, i32) {
    %c0_i32 = arith.constant 0 : i32
    %c0_i32_0 = arith.constant 0 : i32
    return %arg0, %c0_i32 : i32, i32
  }
}

</mosaic_0001>

<bundles_post_ra>
// kernel: tpu_custom_call.1
= control target key start
LH: loop header
LB: loop body
LE: loop exit
PB: predicated region body
PF: predicated region fallthrough
CT: control target
= control target key end

     0   :  { %6 = vsyncpa [#allocation3], 0  ;;  %s253_s0 = inlined_call_operand.hbm [shape: f32[16,32], index: 0, kind: input, shape index: {}]   ;;  %s254_s1 = inlined_call_operand.hbm [shape: f32[16,32], index: 1, kind: output, shape index: {}]  }
   0x1   :  { %7 = vsyncpa [#allocation4], 0  ;;  %s12_s8 = sshll.u32 %s253_s0, 4  ;;  %s209_s9 = smov [#allocation2]   ;;  %s13_s8 = int_to_ptr.hbm [resolvable:$true] %s12_s8 }
   0x2   :  { %s14_s10 = sshll.u32 %s209_s9, 4  ;;  %s210_s11 = smov 128   ;;  %s15_s10 = int_to_ptr.vmem [resolvable:$true] %s14_s10 }
   0x3   :  { %s211_s12 = smov 8  }
   0x4   :  { %20 = dma.hbm_to_vmem [thread:$0]  %s13_s8, 256, %s15_s10, [#allocation3], %s210_s11, %s210_s11, %s211_s12  }
   0x5   :  { %205 = dma.done.wait [#allocation3], 256  }
   0x6   :  { %206 = vsyncadd [#allocation3], 4294967040  ;;  %vm27_vm0 = vcmask 261120   ;;  %v25_v0 = vld [vmem:[#allocation2] sm:$0xff]  ;;  %v26_v2 = vld [vmem:[#allocation2 + $0x8] sm:$0xff]  ;;  %v212_v4 = vmov 32.0  }
   0x7   :  { %v28_v1 = vsel %vm27_vm0, %v25_v0, 0.0  ;;  %v31_v3 = vsel %vm27_vm0, %v26_v2, 0.0  ;;  %145 = vrcp.f32 %v212_v4  ;;  %v213_v21 = vmov 31.0   ;;  %s214_s0 = smov [#allocation5]   ;;  %s126_s16 = sshll.u32 %s254_s1, 4  ;;  %s127_s16 = int_to_ptr.hbm [resolvable:$true] %s126_s16 }
   0x8   :  { %29 = vadd.xlane.f32.xlu0 %v28_v1  ;;  %147 = vrcp.f32 %v213_v21  ;;  %s124_s13 = sshll.u32 %s214_s0, 4  ;;  %s125_s13 = int_to_ptr.vmem [resolvable:$true] %s124_s13 }
   0xd   :  { %v146_v5 = vpop.eup %145 }
   0xe   :  { %v35_v6 = vmul.f32 32.0, %v146_v5  ;;  %vm39_vm1 = vweird.f32 %v146_v5  ;;  %v148_v22 = vpop.eup %147 }
   0xf   :  { %v54_v23 = vmul.f32 31.0, %v148_v22  ;;  %vm58_vm2 = vweird.f32 %v148_v22 }
  0x10   :  { %32 = vadd.xlane.f32.xlu0 %v31_v3  ;;  %v36_v7 = vsub.f32 1.0, %v35_v6 }
  0x11   :  { %v55_v24 = vsub.f32 1.0, %v54_v23 }
  0x12   :  { %v37_v8 = vmul.f32 %v146_v5, %v36_v7 }
  0x13   :  { %v56_v25 = vmul.f32 %v148_v22, %v55_v24 }
  0x14   :  { %v38_v9 = vadd.f32 %v146_v5, %v37_v8 }
  0x15   :  { %v57_v26 = vadd.f32 %v148_v22, %v56_v25 }
  0x16   :  { %v40_v10 = vsel %vm39_vm1, %v146_v5, %v38_v9 }
  0x17   :  { %v59_v27 = vsel %vm58_vm2, %v148_v22, %v57_v26 }
  0x7b   :  { %v30_v11 = vpop.xlane.xlu0 %29 }
  0x7c   :  { %v41_v12 = vmul.f32 %v40_v10, %v30_v11 }
  0x7e   :  { %v233_v13 = vsub.f32 %v25_v0, %v41_v12 }
  0x80   :  { %v45_v14 = vmul.f32 %v233_v13, %v233_v13 }
  0x82   :  { %v47_v15 = vsel %vm27_vm0, %v45_v14, 0.0 }
  0x83   :  { %48 = vadd.xlane.f32.xlu1 %v47_v15  ;;  %v33_v16 = vpop.xlane.xlu0 %32 }
  0x84   :  { %v42_v17 = vmul.f32 %v40_v10, %v33_v16 }
  0x86   :  { %v238_v18 = vsub.f32 %v26_v2, %v42_v17 }
  0x88   :  { %v46_v19 = vmul.f32 %v238_v18, %v238_v18 }
  0x8a   :  { %v50_v20 = vsel %vm27_vm0, %v46_v19, 0.0 }
  0x8b   :  { %51 = vadd.xlane.f32.xlu1 %v50_v20 }
  0xf6   :  { %v49_v28 = vpop.xlane.xlu1 %48 }
  0xf7   :  { %v60_v29 = vmul.f32 %v59_v27, %v49_v28 }
  0xf9   :  { %149 = vrsqrt.f32 %v60_v29  ;;  %vm69_vm3 = vcmp.eq.f32.partialorder %v60_v29, inf  ;;  %v72_v42 = vand.u32 2147483648, %v60_v29  ;;  %vm71_vm4 = vcmp.eq.f32.partialorder %v60_v29, 0.0 }
  0xfe   :  { %v52_v30 = vpop.xlane.xlu1 %51 }
  0xff   :  { %v150_v31 = vpop.eup %149  ;;  %v61_v32 = vmul.f32 %v59_v27, %v52_v30 }
 0x100   :  { %v63_v33 = vmul.f32 %v150_v31, %v60_v29 }
 0x101   :  { %151 = vrsqrt.f32 %v61_v32  ;;  %vm81_vm5 = vcmp.eq.f32.partialorder %v61_v32, inf  ;;  %v84_v50 = vand.u32 2147483648, %v61_v32  ;;  %vm83_vm6 = vcmp.eq.f32.partialorder %v61_v32, 0.0 }
 0x102   :  { %v64_v34 = vmul.f32 %v150_v31, %v63_v33 }
 0x104   :  { %v65_v35 = vmul.f32 0.5, %v64_v34 }
 0x106   :  { %v66_v36 = vsub.f32 1.5, %v65_v35 }
 0x107   :  { %v152_v37 = vpop.eup %151 }
 0x108   :  { %v67_v38 = vmul.f32 %v150_v31, %v66_v36  ;;  %v75_v39 = vmul.f32 %v152_v37, %v61_v32 }
 0x10a   :  { %v68_v40 = vmul.f32 %v67_v38, %v60_v29  ;;  %v76_v41 = vmul.f32 %v152_v37, %v75_v39 }
 0x10c   :  { %v70_v43 = vsel %vm69_vm3, %v60_v29, %v68_v40  ;;  %v77_v44 = vmul.f32 0.5, %v76_v41 }
 0x10d   :  { %v73_v45 = vsel %vm71_vm4, %v72_v42, %v70_v43 }
 0x10e   :  { %v78_v46 = vsub.f32 1.5, %v77_v44  ;;  %v86_v47 = vadd.f32 1e-06, %v73_v45 }
 0x110   :  { %v79_v48 = vmul.f32 %v152_v37, %v78_v46  ;;  %153 = vrcp.f32 %v86_v47  ;;  %v99_v57 = vand.u32 2147483648, %v86_v47  ;;  %v97_v59 = vand.u32 2147483647, %v86_v47 }
 0x111   :  { %vm93_vm8 = vweird.f32 %v86_v47 }
 0x112   :  { %v80_v49 = vmul.f32 %v79_v48, %v61_v32  ;;  %v100_v62 = vor.u32 1.1754944e-38, %v99_v57  ;;  %vm98_vm10 = vcmp.eq.f32.partialorder %v97_v59, 8.507059e+37 }
 0x114   :  { %v82_v51 = vsel %vm81_vm5, %v61_v32, %v80_v49 }
 0x115   :  { %v85_v52 = vsel %vm83_vm6, %v84_v50, %v82_v51 }
 0x116   :  { %v154_v53 = vpop.eup %153  ;;  %v87_v54 = vadd.f32 1e-06, %v85_v52 }
 0x117   :  { %v89_v55 = vmul.f32 %v154_v53, %v86_v47  ;;  %vm94_vm7 = vweird.f32 %v154_v53 }
 0x118   :  { %155 = vrcp.f32 %v87_v54  ;;  %vm95_vm9 = vmor %vm93_vm8, %vm94_vm7  ;;  %v113_v4 = vand.u32 2147483648, %v87_v54  ;;  %v111_v6 = vand.u32 2147483647, %v87_v54  ;;  %vm107_vm12 = vweird.f32 %v87_v54 }
 0x119   :  { %v90_v56 = vsub.f32 1.0, %v89_v55 }
 0x11a   :  { %v114_v8 = vor.u32 1.1754944e-38, %v113_v4  ;;  %vm112_vm14 = vcmp.eq.f32.partialorder %v111_v6, 8.507059e+37 }
 0x11b   :  { %v91_v58 = vmul.f32 %v154_v53, %v90_v56 }
 0x11d   :  { %v92_v60 = vadd.f32 %v154_v53, %v91_v58 }
 0x11e   :  { %v156_v61 = vpop.eup %155 }
 0x11f   :  { %v96_v63 = vsel %vm95_vm9, %v154_v53, %v92_v60  ;;  %v103_v0 = vmul.f32 %v156_v61, %v87_v54  ;;  %vm108_vm11 = vweird.f32 %v156_v61 }
 0x120   :  { %v101_v1 = vsel %vm98_vm10, %v100_v62, %v96_v63  ;;  %vm109_vm13 = vmor %vm107_vm12, %vm108_vm11 }
 0x121   :  { %v104_v2 = vsub.f32 1.0, %v103_v0  ;;  %v116_v3 = vmul.f32 %v101_v1, %v233_v13 }
 0x123   :  { %v105_v5 = vmul.f32 %v156_v61, %v104_v2  ;;  %118 = vst.msk [vmem:[#allocation5] sm:$0xff] %vm27_vm0, %v116_v3 }
 0x125   :  { %v106_v7 = vadd.f32 %v156_v61, %v105_v5 }
 0x127   :  { %v110_v9 = vsel %vm109_vm13, %v156_v61, %v106_v7 }
 0x128   :  { %v115_v10 = vsel %vm112_vm14, %v114_v8, %v110_v9 }
 0x129   :  { %v117_v11 = vmul.f32 %v115_v10, %v238_v18 }
 0x12b   :  { %119 = vst.msk [vmem:[#allocation5 + $0x8] sm:$0xff] %vm27_vm0, %v117_v11 }
 0x12c   :  { %132 = dma.vmem_to_hbm [thread:$0]  %s125_s13, 256, %s127_s16, [#allocation4], %s210_s11, %s210_s11, %s211_s12  }
 0x12d   :  { %207 = dma.done.wait [#allocation4], 256  }
 0x12e   :  { %208 = vsyncadd [#allocation4], 4294967040 }
 0x12f   :  { %137 = vsyncpa [#allocation3], 1 }
 0x130   :  { %138 = vsyncpa [#allocation4], 1 }

</bundles_post_ra>
